<compile_context>
chip_gen: v6e
topology: v6e:2x2x1
jax: 0.10.0
libtpu: 0.0.40
codegen_flags: <defaults>
</compile_context>

<pallas_src>
import functools

import jax
import jax.numpy as jnp
from jax.experimental import pallas as pl
from jax.experimental.pallas import tpu as pltpu


_LANE = 128
_MAX_TILE_P = 512     # rows per grid step (mem-bound roofline sweet spot)
_MAX_TILE_K = 512     # contraction tile at production D


def _round_up(x, m):
    return ((x + m - 1) // m) * m


@functools.lru_cache(maxsize=None)
def _vmem_limit_bytes():
    # Budget against this generation's physical VMEM: v7x 64 MiB -> ~48 MiB,
    # v5e/v6e 128 MiB -> 96 MiB.  Fallback (48 MiB) is safe on all chips.
    try:
        cap = int(pltpu.get_tpu_info().vmem_capacity_bytes)
    except Exception:
        cap = 64 * 1024 * 1024
    return int(min(cap * 3 // 4, 96 * 1024 * 1024))


def _choose_tile_p(P):
    # >= 4 grid steps when possible (v7x shards the parallel axis across 2 TCs
    # and each core still needs >= 2 steps to pipeline), capped at 512 rows.
    t = _round_up(max(8, pl.cdiv(P, 4)), 8)
    return int(min(_MAX_TILE_P, t))


def _choose_tile_k(D):
    # Full D when small; otherwise the largest multiple of 128 (<= 512) that
    # divides D, so the big streamed cols tensor never needs host-side padding.
    if D <= _MAX_TILE_K:
        return D
    for tk in range(_MAX_TILE_K, 127, -128):
        if D % tk == 0:
            return tk
    return D


# ----------------------------------------------------------------------------
# Pallas kernels
# ----------------------------------------------------------------------------
def _matmul_bias_kernel(cols_ref, w_ref, b_ref, o_ref, acc_ref):
    # (tile_p, tk) bf16 @ (tk, C_pad) bf16 -> f32 accumulator; bias at the end.
    k = pl.program_id(1)

    @pl.when(k == 0)
    def _():
        acc_ref[...] = jnp.zeros_like(acc_ref)

    acc_ref[...] += jnp.dot(cols_ref[...], w_ref[...],
                            preferred_element_type=jnp.float32)

    @pl.when(k == pl.num_programs(1) - 1)
    def _():
        o_ref[...] = (acc_ref[...] + b_ref[...]).astype(o_ref.dtype)


def _deform_matmul_kernel(cols_ref, mlog_ref, expand_ref, w_ref, b_ref,
                          o_ref, acc_ref):
    # Modulated deformable conv hot path.
    k = pl.program_id(1)

    @pl.when(k == 0)
    def _():
        acc_ref[...] = jnp.zeros_like(acc_ref)

    # sigmoid(x) == 0.5*(1+tanh(0.5*x)): a single EUP op instead of exp+divide.
    mask = 0.5 * (jnp.tanh(0.5 * mlog_ref[...]) + 1.0)            # (tile_p, GK) f32
    # Broadcast the mask across Cg lanes with a tiny 0/1 expansion matmul so
    # the Cg-expanded mask never touches HBM (MXU has plenty of slack here).
    mask_exp = jnp.dot(mask.astype(jnp.bfloat16), expand_ref[...],
                       preferred_element_type=jnp.float32)        # (tile_p, tk)
    # Modulate in f32 (v5e VPU has no bf16 VALU), then cast to bf16 so the
    # main dot hits the bf16 MXU path.  mask_scale (double_mask) is folded
    # into w_ref on the host.
    mod = (cols_ref[...].astype(jnp.float32) * mask_exp).astype(jnp.bfloat16)
    acc_ref[...] += jnp.dot(mod, w_ref[...],
                            preferred_element_type=jnp.float32)

    @pl.when(k == pl.num_programs(1) - 1)
    def _():
        o_ref[...] = (acc_ref[...] + b_ref[...]).astype(o_ref.dtype)


# ----------------------------------------------------------------------------
# Pallas wrappers (lane-dense padded outputs, cdiv row grid, D reduction axis)
# ----------------------------------------------------------------------------
def pallas_matmul_bias(cols, w, b):
    # cols: (P, D); w: (D, C); b: (C,)  ->  (P, C) f32
    P, D = cols.shape
    C = w.shape[1]
    C_pad = _round_up(C, _LANE)
    tile_p = _choose_tile_p(P)
    tk = _choose_tile_k(D)

    w_p = (jnp.pad(w, ((0, 0), (0, C_pad - C))) if C_pad != C else w)
    w_p = w_p.astype(jnp.bfloat16)
    b_p = (jnp.pad(b, (0, C_pad - C)) if C_pad != C else b).astype(jnp.float32)

    out = pl.pallas_call(
        _matmul_bias_kernel,
        out_shape=jax.ShapeDtypeStruct((P, C_pad), jnp.float32),
        grid=(pl.cdiv(P, tile_p), D // tk),
        in_specs=[
            pl.BlockSpec((tile_p, tk), lambda i, k: (i, k)),
            pl.BlockSpec((tk, C_pad), lambda i, k: (k, 0)),
            pl.BlockSpec((1, C_pad), lambda i, k: (0, 0)),
        ],
        out_specs=pl.BlockSpec((tile_p, C_pad), lambda i, k: (i, 0)),
        scratch_shapes=[pltpu.VMEM((tile_p, C_pad), jnp.float32)],
        compiler_params=pltpu.CompilerParams(
            dimension_semantics=("parallel", "arbitrary"),
            vmem_limit_bytes=_vmem_limit_bytes()),
    )(cols.astype(jnp.bfloat16), w_p, b_p.reshape(1, C_pad))
    return out[:, :C]


def pallas_deform_matmul(cols, mlog, expand, w, b):
    # cols: (P, D) with D = dg*KK*Cg (Cg innermost); mlog: (P, dg*KK) logits;
    # expand: (dg*KK, D) 0/1; w: (D, C); b: (C,)  ->  (P, C) f32
    P, D = cols.shape
    GK = mlog.shape[1]
    C = w.shape[1]
    C_pad = _round_up(C, _LANE)
    tile_p = _choose_tile_p(P)
    tk = _choose_tile_k(D)

    w_p = (jnp.pad(w, ((0, 0), (0, C_pad - C))) if C_pad != C else w)
    w_p = w_p.astype(jnp.bfloat16)
    b_p = (jnp.pad(b, (0, C_pad - C)) if C_pad != C else b).astype(jnp.float32)

    out = pl.pallas_call(
        _deform_matmul_kernel,
        out_shape=jax.ShapeDtypeStruct((P, C_pad), jnp.float32),
        grid=(pl.cdiv(P, tile_p), D // tk),
        in_specs=[
            pl.BlockSpec((tile_p, tk), lambda i, k: (i, k)),
            pl.BlockSpec((tile_p, GK), lambda i, k: (i, 0)),
            pl.BlockSpec((GK, tk), lambda i, k: (0, k)),
            pl.BlockSpec((tk, C_pad), lambda i, k: (k, 0)),
            pl.BlockSpec((1, C_pad), lambda i, k: (0, 0)),
        ],
        out_specs=pl.BlockSpec((tile_p, C_pad), lambda i, k: (i, 0)),
        scratch_shapes=[pltpu.VMEM((tile_p, C_pad), jnp.float32)],
        compiler_params=pltpu.CompilerParams(
            dimension_semantics=("parallel", "arbitrary"),
            vmem_limit_bytes=_vmem_limit_bytes()),
    )(cols.astype(jnp.bfloat16), mlog, expand.astype(jnp.bfloat16),
      w_p, b_p.reshape(1, C_pad))
    return out[:, :C]


# ----------------------------------------------------------------------------
# JAX glue: static im2col (offset conv) — produced directly in NHWC tap order
# ----------------------------------------------------------------------------
def im2col_dilated_nhwc(x, K, dilation, pad, stride):
    # x: (N, C, H, W) -> (N, Ho, Wo, C, KK)
    N, C, H, W = x.shape
    Ho = (H + 2 * pad - dilation * (K - 1) - 1) // stride + 1
    Wo = (W + 2 * pad - dilation * (K - 1) - 1) // stride + 1
    x_nhwc = jnp.transpose(x, (0, 2, 3, 1))
    x_p = jnp.pad(x_nhwc, ((0, 0), (pad, pad), (pad, pad), (0, 0)))
    taps = []
    for i in range(K):
        for j in range(K):
            taps.append(
                x_p[:, i * dilation: i * dilation + (Ho - 1) * stride + 1: stride,
                       j * dilation: j * dilation + (Wo - 1) * stride + 1: stride, :])
    return jnp.stack(taps, axis=-1)        # (N, Ho, Wo, C, KK)


def build_blockdiag_offset_weight(w_off, C_in, groups, K):
    # w_off: (C_off, C_in//groups, K, K) -> (C_in*KK, C_off) block-diagonal.
    # NOTE: zeros inflate D by `groups`x; fine at dg=2 / tiny channels (a group
    # grid axis would remove this at scale).
    KK = K * K
    C_off = w_off.shape[0]
    cout_g = C_off // groups
    cin_g = C_in // groups
    full = jnp.zeros((C_in, KK, C_off), w_off.dtype)
    for g in range(groups):
        wg = w_off[g * cout_g:(g + 1) * cout_g]                 # (cout_g, cin_g, K, K)
        wg = wg.transpose(1, 2, 3, 0).reshape(cin_g, KK, cout_g)
        full = full.at[g * cin_g:(g + 1) * cin_g, :, g * cout_g:(g + 1) * cout_g].set(wg)
    return full.reshape(C_in * KK, C_off)


# ----------------------------------------------------------------------------
# JAX glue: deformable bilinear sampling (data-dependent gather)
# Columns come out directly in (N, Ho, Wo, dg, KK, Cg) order -> plain reshape.
# TODO(synk): per-pixel data-dependent bilinear gather has no clean Pallas TPU
#             equivalent here; it runs in plain JAX/XLA and only modulation +
#             matmul run inside the Pallas kernel.
# ----------------------------------------------------------------------------
def deform_im2col(x, off_y, off_x, K, dilation, pad, stride, dg):
    # x: (N, C, H, W); off_y/off_x: (N, Ho, Wo, dg, KK) float offsets
    N, C, H, W = x.shape
    Cg = C // dg
    KK = K * K
    _, Ho, Wo, _, _ = off_y.shape

    # channels-last per-group view for flat gathers: (N, dg*H*W, Cg)
    x_g = x.reshape(N, dg, Cg, H, W).transpose(0, 1, 3, 4, 2).reshape(N, dg * H * W, Cg)

    kk = jnp.arange(KK)
    di = (kk // K) * dilation                      # (KK,)
    dj = (kk % K) * dilation
    py = jnp.arange(Ho) * stride - pad             # (Ho,)
    px = jnp.arange(Wo) * stride - pad             # (Wo,)

    base_y = (py[:, None, None, None] + di[None, None, None, :])   # (Ho,1,1,KK)
    base_x = (px[None, :, None, None] + dj[None, None, None, :])   # (1,Wo,1,KK)
    y = off_y + base_y.astype(off_y.dtype)[None]                   # (N,Ho,Wo,dg,KK)
    xs = off_x + base_x.astype(off_x.dtype)[None, :, :, :, :].reshape(1, 1, Wo, 1, KK)

    y0 = jnp.floor(y); x0 = jnp.floor(xs)
    y1 = y0 + 1.0;     x1 = x0 + 1.0
    ly = y - y0; lx = xs - x0
    hy = 1.0 - ly; hx = 1.0 - lx

    g_base = (jnp.arange(dg, dtype=jnp.int32) * (H * W))[None, None, None, :, None]

    def tap(yi, xi, wgt):
        valid = (yi >= 0) & (yi <= H - 1) & (xi >= 0) & (xi <= W - 1)
        yc = jnp.clip(yi, 0, H - 1).astype(jnp.int32)
        xc = jnp.clip(xi, 0, W - 1).astype(jnp.int32)
        flat = (g_base + yc * W + xc).reshape(N, Ho * Wo * dg * KK)
        v = jnp.take_along_axis(x_g, flat[:, :, None], axis=1)     # (N, L, Cg)
        v = v.reshape(N, Ho, Wo, dg, KK, Cg)
        return v * jnp.where(valid, wgt, 0.0)[..., None]

    cols = (tap(y0, x0, hy * hx) + tap(y0, x1, hy * lx)
            + tap(y1, x0, ly * hx) + tap(y1, x1, ly * lx))
    return cols.reshape(N * Ho * Wo, dg * KK * Cg)                 # (P, D)


# ----------------------------------------------------------------------------
# Full forward (matches DeformConv2d.forward with modulation=True)
# ----------------------------------------------------------------------------
@functools.partial(jax.jit, static_argnames=("K", "stride", "dilation",
                                             "deformable_groups", "double_mask"))
def deform_conv2d_forward(x, w_off, b_off, w_dcn, b_dcn, *,
                          K=3, stride=1, dilation=2, deformable_groups=2,
                          double_mask=True):
    pad = dilation
    N, C_in, H, W = x.shape
    C_out = w_dcn.shape[0]
    KK = K * K
    dg = deformable_groups
    Cg = C_in // dg
    offset_channel = dg * 2 * KK
    Ho = (H + 2 * pad - dilation * (K - 1) - 1) // stride + 1
    Wo = (W + 2 * pad - dilation * (K - 1) - 1) // stride + 1
    P = N * Ho * Wo

    # --- offset_conv: grouped dilated conv = im2col + block-diag Pallas matmul
    patches = im2col_dilated_nhwc(x, K, dilation, pad, stride)      # (N,Ho,Wo,C,KK)
    patches2d = patches.reshape(P, C_in * KK).astype(jnp.bfloat16)  # bf16 streaming
    w_off_mat = build_blockdiag_offset_weight(w_off, C_in, dg, K)   # (C*KK, C_off)
    offset_mask = pallas_matmul_bias(patches2d, w_off_mat, b_off)   # (P, C_off) f32
    offset_mask = offset_mask.reshape(N, Ho, Wo, -1)

    off = offset_mask[..., :offset_channel].reshape(N, Ho, Wo, dg, KK, 2)
    off_y = off[..., 0]                                             # (N,Ho,Wo,dg,KK)
    off_x = off[..., 1]
    mlog = offset_mask[..., offset_channel:].reshape(P, dg * KK)    # mask logits

    # --- deformable sampling (JAX gather) -> (P, dg*KK*Cg), Cg innermost
    cols = deform_im2col(x, off_y, off_x, K, dilation, pad, stride, dg)
    cols = cols.astype(jnp.bfloat16)                                # bf16 streaming

    # weight laid out to match (dg, KK, Cg) lane order; mask_scale folded in
    mask_scale = 2.0 if double_mask else 1.0
    w_mat = (w_dcn.reshape(C_out, dg, Cg, KK).transpose(1, 3, 2, 0)
             .reshape(dg * KK * Cg, C_out).astype(jnp.float32) * mask_scale)
    # 0/1 expansion matrix: E[g*KK+k, (g*KK+k)*Cg + c] = 1
    expand = jnp.repeat(jnp.eye(dg * KK, dtype=jnp.float32), Cg, axis=1)

    out2d = pallas_deform_matmul(cols, mlog, expand, w_mat, b_dcn)  # (P, C_out)
    # Consumer expects NCHW f32 (PyTorch semantics); keep the final transpose.
    return out2d.reshape(N, Ho, Wo, C_out).transpose(0, 3, 1, 2)    # NCHW


# ----------------------------------------------------------------------------
if __name__ == "__main__":
    key = jax.random.PRNGKey(0)
    N, C_in, H, W = 2, 4, 16, 16
    C_out = 4
    K, stride, dilation, dg = 3, 1, 2, 2
    KK = K * K

    k1, k2, k3, k4, k5 = jax.random.split(key, 5)
    x = jax.random.normal(k1, (N, C_in, H, W), jnp.float32)

    # ModulatedDeformConv params: weight (C_out, C_in, K, K), bias (C_out,)
    w_dcn = jax.random.normal(k2, (C_out, C_in, K, K), jnp.float32) * 0.1
    b_dcn = jax.random.normal(k3, (C_out,), jnp.float32) * 0.1

    # offset_conv params (grouped): weight (dg*3*KK, C_in//dg, K, K), bias (dg*3*KK,)
    # (module zero-inits these; small random used so sampling is exercised)
    w_off = jax.random.normal(k4, (dg * 3 * KK, C_in // dg, K, K), jnp.float32) * 0.05
    b_off = jax.random.normal(k5, (dg * 3 * KK,), jnp.float32) * 0.05

    out = deform_conv2d_forward(
        x, w_off, b_off, w_dcn, b_dcn,
        K=K, stride=stride, dilation=dilation,
        deformable_groups=dg, double_mask=True)
    out = jax.block_until_ready(out)

    assert out.shape == (N, C_out, H, W), out.shape
    assert out.dtype == jnp.float32
    assert bool(jnp.all(jnp.isfinite(out)))
    print("KERNEL_OK")
</pallas_src>

<mosaic_0001>
module attributes {stable_mosaic.version = 11 : i64} {
  func.func @_matmul_bias_kernel(%arg0: i32, %arg1: i32, %arg2: memref<128x36xbf16, #tpu.memory_space<vmem>>, %arg3: memref<36x128xbf16, #tpu.memory_space<vmem>>, %arg4: memref<1x128xf32, #tpu.memory_space<vmem>>, %arg5: memref<128x128xf32, #tpu.memory_space<vmem>>, %arg6: memref<128x128xf32, #tpu.memory_space<vmem>>) attributes {dimension_semantics = [#tpu.dimension_semantics<parallel>, #tpu.dimension_semantics<arbitrary>], iteration_bounds = array<i64: 4, 1>, scalar_prefetch = 0 : i64, scratch_operands = 1 : i64, tpu.core_type = #tpu.core_type<tc>, window_params = [{transform_indices = @transform_0, window_bounds = array<i64: 128, 36>}, {transform_indices = @transform_1, window_bounds = array<i64: 36, 128>}, {pipeline_mode = #tpu.pipeline_mode<synchronous>, transform_indices = @transform_2, window_bounds = array<i64: 1, 128>}, {transform_indices = @transform_3, window_bounds = array<i64: 128, 128>}]} {
    %c0_i32 = arith.constant 0 : i32
    %0 = arith.cmpi eq, %arg1, %c0_i32 : i32
    %1 = arith.extui %0 : i1 to i32
    %c0_i32_0 = arith.constant 0 : i32
    %2 = arith.cmpi ne, %1, %c0_i32_0 : i32
    scf.if %2 {
      %cst_10 = arith.constant 0.000000e+00 : f32
      %12 = vector.broadcast %cst_10 : f32 to vector<128x128xf32>
      %c0_11 = arith.constant 0 : index
      %c0_12 = arith.constant 0 : index
      %13 = vector.load %arg6[%c0_11, %c0_12] : memref<128x128xf32, #tpu.memory_space<vmem>>, vector<128x128xf32>
      tpu.vector_store %arg6[%c0_11, %c0_12], %12 {strides = array<i32>} : memref<128x128xf32, #tpu.memory_space<vmem>>, vector<128x128xf32>,
    } else {
    }
    %c0 = arith.constant 0 : index
    %c0_1 = arith.constant 0 : index
    %3 = vector.load %arg6[%c0, %c0_1] : memref<128x128xf32, #tpu.memory_space<vmem>>, vector<128x128xf32>
    %c0_2 = arith.constant 0 : index
    %c0_3 = arith.constant 0 : index
    %4 = vector.load %arg2[%c0_2, %c0_3] : memref<128x36xbf16, #tpu.memory_space<vmem>>, vector<128x36xbf16>
    %c0_4 = arith.constant 0 : index
    %c0_5 = arith.constant 0 : index
    %5 = vector.load %arg3[%c0_4, %c0_5] : memref<36x128xbf16, #tpu.memory_space<vmem>>, vector<36x128xbf16>
    %cst = arith.constant dense<0.000000e+00> : vector<128x128xf32>
    %6 = tpu.matmul %4, %5, %cst {dimension_numbers = #tpu.dot_dimension_numbers<[1], [0], [0], [1], [0, 0, 1, 1], [], []>} : vector<128x36xbf16>, vector<36x128xbf16>, vector<128x128xf32> -> vector<128x128xf32>
    %7 = arith.addf %3, %6 : vector<128x128xf32>
    %c0_6 = arith.constant 0 : index
    %c0_7 = arith.constant 0 : index
    %8 = vector.load %arg6[%c0_6, %c0_7] : memref<128x128xf32, #tpu.memory_space<vmem>>, vector<128x128xf32>
    tpu.vector_store %arg6[%c0_6, %c0_7], %7 {strides = array<i32>} : memref<128x128xf32, #tpu.memory_space<vmem>>, vector<128x128xf32>,
    %c0_i32_8 = arith.constant 0 : i32
    %9 = arith.cmpi eq, %arg1, %c0_i32_8 : i32
    %10 = arith.extui %9 : i1 to i32
    %c0_i32_9 = arith.constant 0 : i32
    %11 = arith.cmpi ne, %10, %c0_i32_9 : i32
    scf.if %11 {
      %c0_10 = arith.constant 0 : index
      %c0_11 = arith.constant 0 : index
      %12 = vector.load %arg6[%c0_10, %c0_11] : memref<128x128xf32, #tpu.memory_space<vmem>>, vector<128x128xf32>
      %c0_12 = arith.constant 0 : index
      %c0_13 = arith.constant 0 : index
      %13 = vector.load %arg4[%c0_12, %c0_13] : memref<1x128xf32, #tpu.memory_space<vmem>>, vector<1x128xf32>
      %14 = vector.broadcast %13 : vector<1x128xf32> to vector<128x128xf32>
      %15 = arith.addf %12, %14 : vector<128x128xf32>
      %c0_14 = arith.constant 0 : index
      %c0_15 = arith.constant 0 : index
      %16 = vector.load %arg5[%c0_14, %c0_15] : memref<128x128xf32, #tpu.memory_space<vmem>>, vector<128x128xf32>
      tpu.vector_store %arg5[%c0_14, %c0_15], %15 {strides = array<i32>} : memref<128x128xf32, #tpu.memory_space<vmem>>, vector<128x128xf32>,
    } else {
    }
    return
  }
  func.func @transform_0(%arg0: i32, %arg1: i32) -> (i32, i32) {
    %c0_i32 = arith.constant 0 : i32
    return %arg0, %arg1 : i32, i32
  }
  func.func @transform_1(%arg0: i32, %arg1: i32) -> (i32, i32) {
    %c0_i32 = arith.constant 0 : i32
    %c0_i32_0 = arith.constant 0 : i32
    return %arg1, %c0_i32 : i32, i32
  }
  func.func @transform_2(%arg0: i32, %arg1: i32) -> (i32, i32) {
    %c0_i32 = arith.constant 0 : i32
    %c0_i32_0 = arith.constant 0 : i32
    %c0_i32_1 = arith.constant 0 : i32
    return %c0_i32, %c0_i32_0 : i32, i32
  }
  func.func @transform_3(%arg0: i32, %arg1: i32) -> (i32, i32) {
    %c0_i32 = arith.constant 0 : i32
    %c0_i32_0 = arith.constant 0 : i32
    return %arg0, %c0_i32 : i32, i32
  }
}

module attributes {stable_mosaic.version = 11 : i64} {
  func.func @_deform_matmul_kernel(%arg0: i32, %arg1: i32, %arg2: memref<128x36xbf16, #tpu.memory_space<vmem>>, %arg3: memref<128x18xf32, #tpu.memory_space<vmem>>, %arg4: memref<18x36xbf16, #tpu.memory_space<vmem>>, %arg5: memref<36x128xbf16, #tpu.memory_space<vmem>>, %arg6: memref<1x128xf32, #tpu.memory_space<vmem>>, %arg7: memref<128x128xf32, #tpu.memory_space<vmem>>, %arg8: memref<128x128xf32, #tpu.memory_space<vmem>>) attributes {dimension_semantics = [#tpu.dimension_semantics<parallel>, #tpu.dimension_semantics<arbitrary>], iteration_bounds = array<i64: 4, 1>, scalar_prefetch = 0 : i64, scratch_operands = 1 : i64, tpu.core_type = #tpu.core_type<tc>, window_params = [{transform_indices = @transform_0, window_bounds = array<i64: 128, 36>}, {transform_indices = @transform_1, window_bounds = array<i64: 128, 18>}, {transform_indices = @transform_2, window_bounds = array<i64: 18, 36>}, {transform_indices = @transform_3, window_bounds = array<i64: 36, 128>}, {pipeline_mode = #tpu.pipeline_mode<synchronous>, transform_indices = @transform_4, window_bounds = array<i64: 1, 128>}, {transform_indices = @transform_5, window_bounds = array<i64: 128, 128>}]} {
    %c0_i32 = arith.constant 0 : i32
    %0 = arith.cmpi eq, %arg1, %c0_i32 : i32
    %1 = arith.extui %0 : i1 to i32
    %c0_i32_0 = arith.constant 0 : i32
    %2 = arith.cmpi ne, %1, %c0_i32_0 : i32
    scf.if %2 {
      %cst_18 = arith.constant 0.000000e+00 : f32
      %26 = vector.broadcast %cst_18 : f32 to vector<128x128xf32>
      %c0_19 = arith.constant 0 : index
      %c0_20 = arith.constant 0 : index
      %27 = vector.load %arg8[%c0_19, %c0_20] : memref<128x128xf32, #tpu.memory_space<vmem>>, vector<128x128xf32>
      tpu.vector_store %arg8[%c0_19, %c0_20], %26 {strides = array<i32>} : memref<128x128xf32, #tpu.memory_space<vmem>>, vector<128x128xf32>,
    } else {
    }
    %c0 = arith.constant 0 : index
    %c0_1 = arith.constant 0 : index
    %3 = vector.load %arg3[%c0, %c0_1] : memref<128x18xf32, #tpu.memory_space<vmem>>, vector<128x18xf32>
    %cst = arith.constant 5.000000e-01 : f32
    %4 = vector.broadcast %cst : f32 to vector<128x18xf32>
    %5 = arith.mulf %4, %3 : vector<128x18xf32>
    %6 = math.tanh %5 : vector<128x18xf32>
    %cst_2 = arith.constant 1.000000e+00 : f32
    %7 = vector.broadcast %cst_2 : f32 to vector<128x18xf32>
    %8 = arith.addf %6, %7 : vector<128x18xf32>
    %cst_3 = arith.constant 5.000000e-01 : f32
    %9 = vector.broadcast %cst_3 : f32 to vector<128x18xf32>
    %10 = arith.mulf %9, %8 : vector<128x18xf32>
    %11 = arith.truncf %10 : vector<128x18xf32> to vector<128x18xbf16>
    %c0_4 = arith.constant 0 : index
    %c0_5 = arith.constant 0 : index
    %12 = vector.load %arg4[%c0_4, %c0_5] : memref<18x36xbf16, #tpu.memory_space<vmem>>, vector<18x36xbf16>
    %cst_6 = arith.constant dense<0.000000e+00> : vector<128x36xf32>
    %13 = tpu.matmul %11, %12, %cst_6 {dimension_numbers = #tpu.dot_dimension_numbers<[1], [0], [0], [1], [0, 0, 1, 1], [], []>} : vector<128x18xbf16>, vector<18x36xbf16>, vector<128x36xf32> -> vector<128x36xf32>
    %c0_7 = arith.constant 0 : index
    %c0_8 = arith.constant 0 : index
    %14 = vector.load %arg2[%c0_7, %c0_8] : memref<128x36xbf16, #tpu.memory_space<vmem>>, vector<128x36xbf16>
    %15 = arith.extf %14 : vector<128x36xbf16> to vector<128x36xf32>
    %16 = arith.mulf %15, %13 : vector<128x36xf32>
    %17 = arith.truncf %16 : vector<128x36xf32> to vector<128x36xbf16>
    %c0_9 = arith.constant 0 : index
    %c0_10 = arith.constant 0 : index
    %18 = vector.load %arg8[%c0_9, %c0_10] : memref<128x128xf32, #tpu.memory_space<vmem>>, vector<128x128xf32>
    %c0_11 = arith.constant 0 : index
    %c0_12 = arith.constant 0 : index
    %19 = vector.load %arg5[%c0_11, %c0_12] : memref<36x128xbf16, #tpu.memory_space<vmem>>, vector<36x128xbf16>
    %cst_13 = arith.constant dense<0.000000e+00> : vector<128x128xf32>
    %20 = tpu.matmul %17, %19, %cst_13 {dimension_numbers = #tpu.dot_dimension_numbers<[1], [0], [0], [1], [0, 0, 1, 1], [], []>} : vector<128x36xbf16>, vector<36x128xbf16>, vector<128x128xf32> -> vector<128x128xf32>
    %21 = arith.addf %18, %20 : vector<128x128xf32>
    %c0_14 = arith.constant 0 : index
    %c0_15 = arith.constant 0 : index
    %22 = vector.load %arg8[%c0_14, %c0_15] : memref<128x128xf32, #tpu.memory_space<vmem>>, vector<128x128xf32>
    tpu.vector_store %arg8[%c0_14, %c0_15], %21 {strides = array<i32>} : memref<128x128xf32, #tpu.memory_space<vmem>>, vector<128x128xf32>,
    %c0_i32_16 = arith.constant 0 : i32
    %23 = arith.cmpi eq, %arg1, %c0_i32_16 : i32
    %24 = arith.extui %23 : i1 to i32
    %c0_i32_17 = arith.constant 0 : i32
    %25 = arith.cmpi ne, %24, %c0_i32_17 : i32
    scf.if %25 {
      %c0_18 = arith.constant 0 : index
      %c0_19 = arith.constant 0 : index
      %26 = vector.load %arg8[%c0_18, %c0_19] : memref<128x128xf32, #tpu.memory_space<vmem>>, vector<128x128xf32>
      %c0_20 = arith.constant 0 : index
      %c0_21 = arith.constant 0 : index
      %27 = vector.load %arg6[%c0_20, %c0_21] : memref<1x128xf32, #tpu.memory_space<vmem>>, vector<1x128xf32>
      %28 = vector.broadcast %27 : vector<1x128xf32> to vector<128x128xf32>
      %29 = arith.addf %26, %28 : vector<128x128xf32>
      %c0_22 = arith.constant 0 : index
      %c0_23 = arith.constant 0 : index
      %30 = vector.load %arg7[%c0_22, %c0_23] : memref<128x128xf32, #tpu.memory_space<vmem>>, vector<128x128xf32>
      tpu.vector_store %arg7[%c0_22, %c0_23], %29 {strides = array<i32>} : memref<128x128xf32, #tpu.memory_space<vmem>>, vector<128x128xf32>,
    } else {
    }
    return
  }
  func.func @transform_0(%arg0: i32, %arg1: i32) -> (i32, i32) {
    %c0_i32 = arith.constant 0 : i32
    return %arg0, %arg1 : i32, i32
  }
  func.func @transform_1(%arg0: i32, %arg1: i32) -> (i32, i32) {
    %c0_i32 = arith.constant 0 : i32
    %c0_i32_0 = arith.constant 0 : i32
    return %arg0, %c0_i32 : i32, i32
  }
  func.func @transform_2(%arg0: i32, %arg1: i32) -> (i32, i32) {
    %c0_i32 = arith.constant 0 : i32
    %c0_i32_0 = arith.constant 0 : i32
    return %c0_i32, %arg1 : i32, i32
  }
  func.func @transform_3(%arg0: i32, %arg1: i32) -> (i32, i32) {
    %c0_i32 = arith.constant 0 : i32
    %c0_i32_0 = arith.constant 0 : i32
    return %arg1, %c0_i32 : i32, i32
  }
  func.func @transform_4(%arg0: i32, %arg1: i32) -> (i32, i32) {
    %c0_i32 = arith.constant 0 : i32
    %c0_i32_0 = arith.constant 0 : i32
    %c0_i32_1 = arith.constant 0 : i32
    return %c0_i32, %c0_i32_0 : i32, i32
  }
  func.func @transform_5(%arg0: i32, %arg1: i32) -> (i32, i32) {
    %c0_i32 = arith.constant 0 : i32
    %c0_i32_0 = arith.constant 0 : i32
    return %arg0, %c0_i32 : i32, i32
  }
}

</mosaic_0001>

<bundles_post_ra>
// kernel: deform_conv2d_forward.2
= control target key start
LH: loop header
LB: loop body
LE: loop exit
PB: predicated region body
PF: predicated region fallthrough
CT: control target
= control target key end

     0   :  { %s783_s12 = smov 0   ;;  %s785_s13 = smov 0   ;;  %s858_s0 = inlined_call_operand.vmem [shape: bf16[512,36], index: 0, kind: input, shape index: {}]   ;;  %s859_s1 = inlined_call_operand.vmem [shape: bf16[36,128], index: 1, kind: input, shape index: {}]   ;;  %s860_s2 = inlined_call_operand.vmem [shape: f32[1,128], index: 2, kind: input, shape index: {}]   ;;  %s861_s3 = inlined_call_operand.vmem [shape: f32[512,128], index: 3, kind: output, shape index: {}]  }
   0x1   :  { %s787_s14 = smov 0  }
   0x2 LB: > { %s25_s15 = sadd.s32 1, %s757_s13  ;;  %p636_p0 = scmp.ge.s32.totalorder %s761_s14, 1  ;;  %s761_s14 = sphi %s787_s14, %s13_s14   ;;  %s757_s13 = sphi %s785_s13, %s863_s13   ;;  %s753_s12 = sphi %s783_s12, %s862_s12  }
   0x3   : > { %p27_p1 = scmp.ge.s32.totalorder %s25_s15, 4  ;;  %p166_p2 = scmp.lt.s32.totalorder %s761_s14, 5 }
   0x5   : > { %s865_s15 = smov (%p27_p1, %s25_s15), 0  ;;  %p167_p3 = pnand %p636_p0, %p166_p2 }
   0x6   : > { %s637_s20 = sshll.u32 (!%p167_p3), %s753_s12, 4 }
   0x7   : > { %170 = sbr.rel (%p167_p3) target bundleno = 235 (0xeb), region = 32  ;;  %p199_p4 = scmp.lt.s32.totalorder (!%p167_p3), %s637_s20, 63 }
   0xc   : > { %v728_v0 = vld [vmem:[%s859_s1 + $0x10] ss:$0 sps:$4 sm:$0x33]   ;;  %vm357_vm0 = vcmask 1041408   ;;  %v729_v1 = vld [vmem:[%s859_s1 + $0x8] sm:$0xff]   ;;  %v730_v3 = vld [vmem:[%s859_s1] sm:$0xff]  }
   0xd   : > { %702 = vmatprep.subr.msk.bf16.mxu0 %vm357_vm0, %v728_v0  ;;  %703 = vmatprep.subr.msk.bf16.mxu1 %vm357_vm0, %v728_v0  ;;  %v359_v2 = vsel %vm357_vm0, %v728_v0, 0  ;;  %s867_s20 = smov (!%p199_p4, %s637_s20), 63  ;;  %vm332_vm1 = vcmask 293888   ;;  %v660_v12 = vld [vmem:[%s860_s2] ss:$0 sm:$0xff] }
   0xe   : > { %675 = vmatpush3.bf16.msra.mxu0 %v359_v2  ;;  %699 = vmatpush3.bf16.msra.mxu1 %v359_v2  ;;  %s638_s23 = sshll.u32 %s867_s20, 2  ;;  %s640_s27 = sshll.u32 %s867_s20, 3 }
   0xf   : > { %676 = vmatprep.subr.bf16.mxu0 %v729_v1  ;;  %697 = vmatprep.subr.bf16.mxu1 %v729_v1  ;;  %s205_s26 = scalar_lea.vmem %s858_s0, %s638_s23  ;;  %s831_s5 = scalar_lea.vmem %s861_s3, %s640_s27 }
  0x10   : > { %v731_v4 = vld [vmem:[%s205_s26] sm:$0xff]   ;;  %v733_v6 = vld [vmem:[%s205_s26 + $0x8] sm:$0xff]   ;;  %v735_v8 = vld [vmem:[%s205_s26 + $0x10] sm:$0xff]  }
  0x11   : > { %v732_v5 = vld [vmem:[%s205_s26 + $0x20] sm:$0xff]   ;;  %680 = vmatprep.mubr.msk.bf16.mxu0 %vm332_vm1, %v731_v4  ;;  %v734_v7 = vld [vmem:[%s205_s26 + $0x28] sm:$0xff]   ;;  %v736_v9 = vld [vmem:[%s205_s26 + $0x30] sm:$0xff]  }
  0x12   : > { %677 = vmatpush3.bf16.msra.mxu0 %v729_v1  ;;  %700 = vmatpush3.bf16.msra.mxu1 %v729_v1  ;;  %v737_v10 = vld [vmem:[%s205_s26 + $0x18] sm:$0xff]  }
  0x13   : > { %678 = vmatprep.subr.bf16.mxu0 %v730_v3  ;;  %698 = vmatprep.subr.bf16.mxu1 %v730_v3  ;;  %v738_v11 = vld [vmem:[%s205_s26 + $0x38] sm:$0xff]  }
  0x14   : > { %688 = vmatprep.mubr.msk.bf16.mxu1 %vm332_vm1, %v732_v5 }
  0x16   : > { %679 = vmatpush3.bf16.msra.mxu0 %v730_v3  ;;  %701 = vmatpush3.bf16.msra.mxu1 %v730_v3 }
  0x19   : > { %681 = vmatmul.mubr.msk.bf16.vlgmr.msra.gmra.mxu0 %vm332_vm1, %v733_v6  ;;  %689 = vmatmul.mubr.msk.bf16.vlgmr.msra.gmra.mxu1 %vm332_vm1, %v734_v7 }
  0x1a   : > { %684 = vmatprep.mubr.msk.bf16.mxu0 %vm332_vm1, %v735_v8  ;;  %692 = vmatprep.mubr.msk.bf16.mxu1 %vm332_vm1, %v736_v9 }
  0x21   : > { %685 = vmatmul.mubr.msk.bf16.gmra.mxu0 %vm332_vm1, %v737_v10  ;;  %693 = vmatmul.mubr.msk.bf16.gmra.mxu1 %vm332_vm1, %v738_v11 }
  0xd9   : > { %v682_v13 = vpop.f32.mrf.mxu0  ;;  %v690_v14 = vpop.f32.mrf.mxu1 }
  0xda   : > { %v518_v15 = vadd.f32 %v682_v13, %v660_v12  ;;  %v526_v16 = vadd.f32 %v690_v14, %v660_v12 }
  0xdb   : > { %v395_v17 = vpop.f32.mrf.mxu0  ;;  %v427_v18 = vpop.f32.mrf.mxu1 }
  0xdc   : > { %534 = vst [vmem:[%s831_s5 + $0x10] sm:$0xff] %v518_v15  ;;  %542 = vst [vmem:[%s831_s5 + $0x50] sm:$0xff] %v526_v16  ;;  %v516_v19 = vadd.f32 %v660_v12, %v395_v17  ;;  %v524_v20 = vadd.f32 %v660_v12, %v427_v18 }
  0xdd   : > { %v683_v21 = vpop.f32.mrf.mxu0  ;;  %v691_v22 = vpop.f32.mrf.mxu1 }
  0xde   : > { %532 = vst [vmem:[%s831_s5] sm:$0xff] %v516_v19  ;;  %540 = vst [vmem:[%s831_s5 + $0x40] sm:$0xff] %v524_v20  ;;  %v519_v23 = vadd.f32 %v683_v21, %v660_v12  ;;  %v527_v24 = vadd.f32 %v691_v22, %v660_v12 }
  0xdf   : > { %v398_v25 = vpop.f32.mrf.mxu0  ;;  %v430_v26 = vpop.f32.mrf.mxu1 }
  0xe0   : > { %535 = vst [vmem:[%s831_s5 + $0x18] sm:$0xff] %v519_v23  ;;  %543 = vst [vmem:[%s831_s5 + $0x58] sm:$0xff] %v527_v24  ;;  %v517_v27 = vadd.f32 %v660_v12, %v398_v25  ;;  %v525_v28 = vadd.f32 %v660_v12, %v430_v26 }
  0xe1   : > { %v686_v29 = vpop.f32.mrf.mxu0  ;;  %v694_v30 = vpop.f32.mrf.mxu1 }
  0xe2   : > { %533 = vst [vmem:[%s831_s5 + $0x8] sm:$0xff] %v517_v27  ;;  %541 = vst [vmem:[%s831_s5 + $0x48] sm:$0xff] %v525_v28  ;;  %v522_v31 = vadd.f32 %v686_v29, %v660_v12  ;;  %v530_v32 = vadd.f32 %v694_v30, %v660_v12 }
  0xe3   : > { %v411_v33 = vpop.f32.mrf.mxu0  ;;  %v443_v34 = vpop.f32.mrf.mxu1 }
  0xe4   : > { %538 = vst [vmem:[%s831_s5 + $0x30] sm:$0xff] %v522_v31  ;;  %546 = vst [vmem:[%s831_s5 + $0x70] sm:$0xff] %v530_v32  ;;  %v520_v35 = vadd.f32 %v660_v12, %v411_v33  ;;  %v528_v36 = vadd.f32 %v660_v12, %v443_v34 }
  0xe5   : > { %v687_v37 = vpop.f32.mrf.mxu0  ;;  %v695_v38 = vpop.f32.mrf.mxu1 }
  0xe6   : > { %536 = vst [vmem:[%s831_s5 + $0x20] sm:$0xff] %v520_v35  ;;  %544 = vst [vmem:[%s831_s5 + $0x60] sm:$0xff] %v528_v36  ;;  %v523_v39 = vadd.f32 %v687_v37, %v660_v12  ;;  %v531_v40 = vadd.f32 %v695_v38, %v660_v12 }
  0xe7   : > { %v414_v41 = vpop.f32.mrf.mxu0  ;;  %v446_v42 = vpop.f32.mrf.mxu1 }
  0xe8   : > { %539 = vst [vmem:[%s831_s5 + $0x38] sm:$0xff] %v523_v39  ;;  %547 = vst [vmem:[%s831_s5 + $0x78] sm:$0xff] %v531_v40  ;;  %v521_v43 = vadd.f32 %v660_v12, %v414_v41  ;;  %v529_v44 = vadd.f32 %v660_v12, %v446_v42 }
  0xea   : > { %537 = vst [vmem:[%s831_s5 + $0x28] sm:$0xff] %v521_v43  ;;  %545 = vst [vmem:[%s831_s5 + $0x68] sm:$0xff] %v529_v44 }
  0xeb PF: > { %s13_s14 = sadd.s32 1, %s761_s14   ;;  %s862_s12 = smov %s757_s13 }
  0xec   : > { %p10_p5 = scmp.ge.s32.totalorder %s13_s14, 6   ;;  %s863_s13 = smov %s865_s15 }
  0xee   :  { %12 = sbr.rel (!%p10_p5) target bundleno = 2 (0x2), region = 73 }

// kernel: deform_conv2d_forward.3
= control target key start
LH: loop header
LB: loop body
LE: loop exit
PB: predicated region body
PF: predicated region fallthrough
CT: control target
= control target key end

     0   :  { %s1233_s18 = smov 0   ;;  %s1235_s19 = smov 0   ;;  %s1357_s0 = inlined_call_operand.vmem [shape: bf16[512,36], index: 0, kind: input, shape index: {}]   ;;  %s1358_s1 = inlined_call_operand.vmem [shape: f32[512,18], index: 1, kind: input, shape index: {}]   ;;  %s1359_s2 = inlined_call_operand.vmem [shape: bf16[18,36], index: 2, kind: input, shape index: {}]   ;;  %s1360_s3 = inlined_call_operand.vmem [shape: bf16[36,128], index: 3, kind: input, shape index: {}]   ;;  %s1361_s4 = inlined_call_operand.vmem [shape: f32[1,128], index: 4, kind: input, shape index: {}]   ;;  %s1362_s5 = inlined_call_operand.vmem [shape: f32[512,128], index: 5, kind: output, shape index: {}]  }
   0x1   :  { %s1237_s20 = smov 0  }
   0x2 LB: > { %s27_s21 = sadd.s32 1, %s1197_s19  ;;  %p983_p0 = scmp.ge.s32.totalorder %s1201_s20, 1  ;;  %s1201_s20 = sphi %s1237_s20, %s15_s20   ;;  %s1197_s19 = sphi %s1235_s19, %s1364_s19   ;;  %s1193_s18 = sphi %s1233_s18, %s1363_s18  }
   0x3   : > { %p29_p1 = scmp.ge.s32.totalorder %s27_s21, 4  ;;  %p236_p2 = scmp.lt.s32.totalorder %s1201_s20, 5 }
   0x5   : > { %s1366_s21 = smov (%p29_p1, %s27_s21), 0  ;;  %p237_p3 = pnand %p983_p0, %p236_p2 }
   0x6   : > { %s984_s26 = sshll.u32 (!%p237_p3), %s1193_s18, 4 }
   0x7   : > { %240 = sbr.rel (%p237_p3) target bundleno = 471 (0x1d7), region = 40  ;;  %p282_p4 = scmp.lt.s32.totalorder (!%p237_p3), %s984_s26, 63 }
   0xc   : > { %v1142_v0 = vld [vmem:[%s1359_s2 + $0x8] ss:$0 sps:$4 sm:$0x11]   ;;  %vm458_vm0 = vcmask 1040384   ;;  %v1143_v1 = vld [vmem:[%s1359_s2] sm:$0xff]   ;;  %s1368_s26 = smov (!%p282_p4, %s984_s26), 63 }
   0xd   : > { %1116 = vmatprep.subr.msk.bf16.mxu0 %vm458_vm0, %v1142_v0  ;;  %v460_v2 = vsel %vm458_vm0, %v1142_v0, 0  ;;  %s987_s27 = sshll.u32 %s1368_s26, 3  ;;  %vm433_vm1 = vcmask 146432   ;;  %vm676_vm2 = vcmask 1041408   ;;  %s985_s12 = sshll.u32 %s1368_s26, 2  ;;  %vm651_vm3 = vcmask 293888  }
   0xe   : > { %1075 = vmatpush3.bf16.msra.mxu0 %v460_v2  ;;  %s1265_s30 = scalar_lea.vmem %s1358_s1, %s987_s27  ;;  %s1304_s15 = scalar_lea.vmem %s1357_s0, %s985_s12 }
   0xf   : > { %1076 = vmatprep.subr.bf16.mxu0 %v1143_v1  ;;  %v333_v3 = vld [vmem:[%s1265_s30] sm:$0xff]  ;;  %v334_v4 = vld [vmem:[%s1265_s30 + $0x8] sm:$0xff]  ;;  %v335_v5 = vld [vmem:[%s1265_s30 + $0x10] sm:$0xff]  ;;  %s1330_s23 = scalar_lea.vmem %s1362_s5, %s987_s27 }
  0x10   : > { %v349_v6 = vmul.f32 0.5, %v333_v3  ;;  %v350_v7 = vmul.f32 0.5, %v334_v4  ;;  %v336_v8 = vld [vmem:[%s1265_s30 + $0x18] sm:$0xff]  ;;  %v351_v9 = vmul.f32 0.5, %v335_v5  ;;  %v337_v10 = vld [vmem:[%s1265_s30 + $0x20] sm:$0xff]  ;;  %v338_v11 = vld [vmem:[%s1265_s30 + $0x28] sm:$0xff] }
  0x11   : > { %v352_v12 = vmul.f32 0.5, %v336_v8  ;;  %v339_v13 = vld [vmem:[%s1265_s30 + $0x30] sm:$0xff]  ;;  %v353_v14 = vmul.f32 0.5, %v337_v10  ;;  %v340_v15 = vld [vmem:[%s1265_s30 + $0x38] sm:$0xff]  ;;  %v354_v16 = vmul.f32 0.5, %v338_v11  ;;  %v341_v17 = vld [vmem:[%s1265_s30 + $0x40] sm:$0xff] }
  0x12   : > { %1077 = vmatpush3.bf16.msra.mxu0 %v1143_v1  ;;  %1147 = vtanh.f32 %v349_v6  ;;  %v355_v18 = vmul.f32 0.5, %v339_v13  ;;  %v342_v19 = vld [vmem:[%s1265_s30 + $0x48] sm:$0xff]  ;;  %v356_v20 = vmul.f32 0.5, %v340_v15  ;;  %v343_v21 = vld [vmem:[%s1265_s30 + $0x50] sm:$0xff]  ;;  %v357_v22 = vmul.f32 0.5, %v341_v17  ;;  %v344_v23 = vld [vmem:[%s1265_s30 + $0x58] sm:$0xff] }
  0x13   : > { %1149 = vtanh.f32 %v350_v7  ;;  %v358_v24 = vmul.f32 0.5, %v342_v19  ;;  %v345_v25 = vld [vmem:[%s1265_s30 + $0x60] sm:$0xff]  ;;  %v359_v26 = vmul.f32 0.5, %v343_v21  ;;  %v346_v27 = vld [vmem:[%s1265_s30 + $0x68] sm:$0xff]  ;;  %v360_v28 = vmul.f32 0.5, %v344_v23  ;;  %v347_v31 = vld [vmem:[%s1265_s30 + $0x70] sm:$0xff] }
  0x14   : > { %1151 = vtanh.f32 %v351_v9  ;;  %v361_v29 = vmul.f32 0.5, %v345_v25  ;;  %v362_v30 = vmul.f32 0.5, %v346_v27  ;;  %v348_v32 = vld [vmem:[%s1265_s30 + $0x78] sm:$0xff]  ;;  %v363_v36 = vmul.f32 0.5, %v347_v31 }
  0x15   : > { %1153 = vtanh.f32 %v352_v12  ;;  %v364_v39 = vmul.f32 0.5, %v348_v32  ;;  %v1144_v27 = vld [vmem:[%s1360_s3 + $0x10] ss:$0 sps:$4 sm:$0x33]   ;;  %v1015_v32 = vld [vmem:[%s1304_s15] sm:$0xff]  }
  0x16   : > { %1155 = vtanh.f32 %v353_v14  ;;  %1117 = vmatprep.subr.msk.bf16.mxu1 %vm676_vm2, %v1144_v27 }
  0x17   : > { %1157 = vtanh.f32 %v354_v16 }
  0x18   : > { %1159 = vtanh.f32 %v355_v18 }
  0x19   : > { %1161 = vtanh.f32 %v356_v20 }
  0x1a   : > { %1163 = vtanh.f32 %v357_v22 }
  0x1b   : > { %1165 = vtanh.f32 %v358_v24 }
  0x1c   : > { %1167 = vtanh.f32 %v359_v26 }
  0x1d   : > { %1169 = vtanh.f32 %v360_v28  ;;  %v678_v28 = vsel %vm676_vm2, %v1144_v27, 0 }
  0x1e   : > { %1171 = vtanh.f32 %v361_v29  ;;  %1095 = vmatpush3.bf16.msra.mxu1 %v678_v28  ;;  %v1145_v29 = vld [vmem:[%s1360_s3 + $0x8] sm:$0xff]  }
  0x1f   : > { %v1148_v33 = vpop.eup %1147  ;;  %1173 = vtanh.f32 %v362_v30  ;;  %1096 = vmatprep.subr.bf16.mxu1 %v1145_v29  ;;  %v1146_v30 = vld [vmem:[%s1360_s3] sm:$0xff]  }
  0x20   : > { %v1150_v34 = vpop.eup %1149  ;;  %v381_v35 = vadd.f32 1.0, %v1148_v33  ;;  %1175 = vtanh.f32 %v363_v36  ;;  %v1046_v33 = vld [vmem:[%s1304_s15 + $0x8] sm:$0xff]   ;;  %v1016_v36 = vunpack.c.l.bf16 %v1015_v32 }
  0x21   : > { %v1152_v37 = vpop.eup %1151  ;;  %v382_v38 = vadd.f32 1.0, %v1150_v34  ;;  %1177 = vtanh.f32 %v364_v39 }
  0x22   : > { %v1154_v40 = vpop.eup %1153  ;;  %v397_v41 = vmul.f32 0.5, %v381_v35  ;;  %v383_v42 = vadd.f32 1.0, %v1152_v37  ;;  %1097 = vmatpush3.bf16.msra.mxu1 %v1145_v29  ;;  %v1021_v35 = vunpack.c.h.bf16 %v1046_v33  ;;  %v1017_v37 = vunpack.c.h.bf16 %v1015_v32 }
  0x23   : > { %v1156_v43 = vpop.eup %1155  ;;  %v398_v44 = vmul.f32 0.5, %v382_v38  ;;  %v384_v45 = vadd.f32 1.0, %v1154_v40  ;;  %1098 = vmatprep.subr.bf16.mxu1 %v1146_v30  ;;  %v1020_v38 = vunpack.c.l.bf16 %v1046_v33 }
  0x24   : > { %v1158_v46 = vpop.eup %1157  ;;  %v399_v47 = vmul.f32 0.5, %v383_v42  ;;  %v385_v48 = vadd.f32 1.0, %v1156_v43 }
  0x25   : > { %v1160_v49 = vpop.eup %1159  ;;  %v413_v50 = vpack.c.bf16 %v398_v44, %v397_v41  ;;  %v400_v51 = vmul.f32 0.5, %v384_v45  ;;  %v386_v52 = vadd.f32 1.0, %v1158_v46  ;;  %v1047_v46 = vld [vmem:[%s1304_s15 + $0x10] sm:$0xff]  }
  0x26   : > { %v1162_v53 = vpop.eup %1161  ;;  %v401_v54 = vmul.f32 0.5, %v385_v48  ;;  %v387_v55 = vadd.f32 1.0, %v1160_v49  ;;  %1099 = vmatpush3.bf16.msra.mxu1 %v1146_v30 }
  0x27   : > { %v1164_v56 = vpop.eup %1163  ;;  %1078 = vmatprep.mubr.msk.bf16.mxu0 %vm433_vm1, %v413_v50  ;;  %v414_v57 = vpack.c.bf16 %v400_v51, %v399_v47  ;;  %v402_v58 = vmul.f32 0.5, %v386_v52  ;;  %v388_v59 = vadd.f32 1.0, %v1162_v53  ;;  %v1048_v47 = vld [vmem:[%s1304_s15 + $0x18] sm:$0xff]   ;;  %v1024_v52 = vunpack.c.l.bf16 %v1047_v46 }
  0x28   : > { %v1166_v60 = vpop.eup %1165  ;;  %v389_v61 = vadd.f32 1.0, %v1164_v56  ;;  %v403_v0 = vmul.f32 0.5, %v387_v55  ;;  %v1029_v51 = vunpack.c.h.bf16 %v1048_v47  ;;  %v1025_v53 = vunpack.c.h.bf16 %v1047_v46 }
  0x29   : > { %v1168_v62 = vpop.eup %1167  ;;  %1079 = vmatmul.mubr.msk.bf16.vlgmr.msra.gmra.mxu0 %vm433_vm1, %v414_v57  ;;  %v415_v63 = vpack.c.bf16 %v402_v58, %v401_v54  ;;  %v404_v1 = vmul.f32 0.5, %v388_v59  ;;  %v390_v2 = vadd.f32 1.0, %v1166_v60  ;;  %v1028_v54 = vunpack.c.l.bf16 %v1048_v47 }
  0x2a   : > { %v1170_v3 = vpop.eup %1169  ;;  %v405_v4 = vmul.f32 0.5, %v389_v61  ;;  %v391_v9 = vadd.f32 1.0, %v1168_v62  ;;  %v1049_v62 = vld [vmem:[%s1304_s15 + $0x20] sm:$0xff]  }
  0x2b   : > { %v1172_v5 = vpop.eup %1171  ;;  %1082 = vmatprep.mubr.msk.bf16.mxu0 %vm433_vm1, %v415_v63  ;;  %v406_v6 = vmul.f32 0.5, %v390_v2  ;;  %v416_v8 = vpack.c.bf16 %v404_v1, %v403_v0  ;;  %v392_v10 = vadd.f32 1.0, %v1170_v3  ;;  %v1050_v0 = vld [vmem:[%s1304_s15 + $0x28] sm:$0xff]  }
  0x2c   : > { %v1174_v7 = vpop.eup %1173  ;;  %v393_v12 = vadd.f32 1.0, %v1172_v5  ;;  %v407_v15 = vmul.f32 0.5, %v391_v9  ;;  %v1037_v3 = vunpack.c.h.bf16 %v1050_v0  ;;  %v1033_v5 = vunpack.c.h.bf16 %v1049_v62 }
  0x2d   : > { %v417_v11 = vpack.c.bf16 %v406_v6, %v405_v4  ;;  %v394_v13 = vadd.f32 1.0, %v1174_v7  ;;  %v1176_v14 = vpop.eup %1175  ;;  %v408_v16 = vmul.f32 0.5, %v392_v10  ;;  %v1032_v4 = vunpack.c.l.bf16 %v1049_v62 }
  0x2e   : > { %v1178_v17 = vpop.eup %1177  ;;  %v409_v18 = vmul.f32 0.5, %v393_v12  ;;  %v395_v21 = vadd.f32 1.0, %v1176_v14  ;;  %v1036_v6 = vunpack.c.l.bf16 %v1050_v0  ;;  %v1051_v14 = vld [vmem:[%s1304_s15 + $0x30] sm:$0xff]  }
  0x2f   : > { %v410_v19 = vmul.f32 0.5, %v394_v13  ;;  %v418_v20 = vpack.c.bf16 %v408_v16, %v407_v15  ;;  %v396_v22 = vadd.f32 1.0, %v1178_v17  ;;  %v1052_v16 = vld [vmem:[%s1304_s15 + $0x38] sm:$0xff]  }
  0x30   : > { %v411_v24 = vmul.f32 0.5, %v395_v21  ;;  %v1041_v21 = vunpack.c.h.bf16 %v1051_v14 }
  0x31   : > { %1083 = vmatmul.mubr.msk.bf16.gmra.mxu0 %vm433_vm1, %v416_v8  ;;  %v419_v23 = vpack.c.bf16 %v410_v19, %v409_v18  ;;  %v412_v25 = vmul.f32 0.5, %v396_v22  ;;  %v1045_v19 = vunpack.c.h.bf16 %v1052_v16  ;;  %v1044_v22 = vunpack.c.l.bf16 %v1052_v16 }
  0x32   : > { %1086 = vmatprep.mubr.msk.bf16.mxu0 %vm433_vm1, %v417_v11 }
  0x33   : > { %v420_v26 = vpack.c.bf16 %v412_v25, %v411_v24 }
  0x39   : > { %1087 = vmatmul.mubr.msk.bf16.gmra.mxu0 %vm433_vm1, %v418_v20  ;;  %v1040_v20 = vunpack.c.l.bf16 %v1051_v14 }
  0x3a   : > { %1090 = vmatprep.mubr.msk.bf16.mxu0 %vm433_vm1, %v419_v23 }
  0x41   : > { %1091 = vmatmul.mubr.msk.bf16.gmra.mxu0 %vm433_vm1, %v420_v26 }
  0xe9   : > { %v1080_v31 = vpop.f32.mrf.mxu0 }
  0xea   : > { %v593_v44 = vmul.f32 %v1080_v31, %v1020_v38  ;;  %v1011_v31 = vld [vmem:[%s1361_s4] ss:$0 sm:$0xff] }
  0xeb   : > { %v496_v34 = vpop.f32.mrf.mxu0 }
  0xec   : > { %v591_v42 = vmul.f32 %v1016_v36, %v496_v34 }
  0xed   : > { %v1081_v39 = vpop.f32.mrf.mxu0 }
  0xee   : > { %v594_v40 = vmul.f32 %v1081_v39, %v1021_v35 }
  0xef   : > { %v499_v41 = vpop.f32.mrf.mxu0 }
  0xf0   : > { %v592_v43 = vmul.f32 %v1017_v37, %v499_v41  ;;  %v608_v49 = vpack.c.bf16 %v594_v40, %v593_v44 }
  0xf1   : > { %v1084_v45 = vpop.f32.mrf.mxu0 }
  0xf2   : > { %v607_v48 = vpack.c.bf16 %v592_v43, %v591_v42  ;;  %v597_v60 = vmul.f32 %v1084_v45, %v1028_v54 }
  0xf3   : > { %v512_v50 = vpop.f32.mrf.mxu0 }
  0xf4   : > { %1100 = vmatprep.mubr.msk.bf16.mxu1 %vm651_vm3, %v607_v48  ;;  %v595_v58 = vmul.f32 %v1024_v52, %v512_v50 }
  0xf5   : > { %v1085_v55 = vpop.f32.mrf.mxu0  ;;  %1101 = vmatmul.mubr.msk.bf16.vlgmr.msra.gmra.mxu1 %vm651_vm3, %v608_v49 }
  0xf6   : > { %v598_v56 = vmul.f32 %v1085_v55, %v1029_v51 }
  0xf7   : > { %v515_v57 = vpop.f32.mrf.mxu0 }
  0xf8   : > { %v596_v59 = vmul.f32 %v1025_v53, %v515_v57  ;;  %v610_v1 = vpack.c.bf16 %v598_v56, %v597_v60 }
  0xf9   : > { %v1088_v61 = vpop.f32.mrf.mxu0 }
  0xfa   : > { %v609_v63 = vpack.c.bf16 %v596_v59, %v595_v58  ;;  %v601_v12 = vmul.f32 %v1088_v61, %v1036_v6 }
  0xfb   : > { %v528_v2 = vpop.f32.mrf.mxu0 }
  0xfc   : > { %1104 = vmatprep.mubr.msk.bf16.mxu1 %vm651_vm3, %v609_v63  ;;  %v599_v10 = vmul.f32 %v1032_v4, %v528_v2 }
  0xfd   : > { %v1089_v7 = vpop.f32.mrf.mxu0  ;;  %1105 = vmatmul.mubr.msk.bf16.gmra.mxu1 %vm651_vm3, %v610_v1 }
  0xfe   : > { %v602_v8 = vmul.f32 %v1089_v7, %v1037_v3 }
  0xff   : > { %v531_v9 = vpop.f32.mrf.mxu0 }
 0x100   : > { %v600_v11 = vmul.f32 %v1033_v5, %v531_v9  ;;  %v612_v17 = vpack.c.bf16 %v602_v8, %v601_v12 }
 0x101   : > { %v1092_v13 = vpop.f32.mrf.mxu0 }
 0x102   : > { %v611_v15 = vpack.c.bf16 %v600_v11, %v599_v10  ;;  %v605_v28 = vmul.f32 %v1092_v13, %v1044_v22 }
 0x103   : > { %v544_v18 = vpop.f32.mrf.mxu0 }
 0x104   : > { %1108 = vmatprep.mubr.msk.bf16.mxu1 %vm651_vm3, %v611_v15  ;;  %v603_v26 = vmul.f32 %v1040_v20, %v544_v18 }
 0x105   : > { %v1093_v23 = vpop.f32.mrf.mxu0  ;;  %1109 = vmatmul.mubr.msk.bf16.gmra.mxu1 %vm651_vm3, %v612_v17 }
 0x106   : > { %v606_v24 = vmul.f32 %v1093_v23, %v1045_v19 }
 0x107   : > { %v547_v25 = vpop.f32.mrf.mxu0 }
 0x108   : > { %v604_v27 = vmul.f32 %v1041_v21, %v547_v25  ;;  %v614_v30 = vpack.c.bf16 %v606_v24, %v605_v28 }
 0x10a   : > { %v613_v29 = vpack.c.bf16 %v604_v27, %v603_v26 }
 0x10c   : > { %1112 = vmatprep.mubr.msk.bf16.mxu1 %vm651_vm3, %v613_v29 }
 0x10d   : > { %1113 = vmatmul.mubr.msk.bf16.gmra.mxu1 %vm651_vm3, %v614_v30 }
 0x1b5   : > { %v1102_v32 = vpop.f32.mrf.mxu1 }
 0x1b6   : > { %v837_v33 = vadd.f32 %v1102_v32, %v1011_v31 }
 0x1b7   : > { %v714_v34 = vpop.f32.mrf.mxu1 }
 0x1b8   : > { %853 = vst [vmem:[%s1330_s23 + $0x10] sm:$0xff] %v837_v33  ;;  %v835_v35 = vadd.f32 %v1011_v31, %v714_v34 }
 0x1b9   : > { %v1103_v36 = vpop.f32.mrf.mxu1 }
 0x1ba   : > { %851 = vst [vmem:[%s1330_s23] sm:$0xff] %v835_v35  ;;  %v838_v37 = vadd.f32 %v1103_v36, %v1011_v31 }
 0x1bb   : > { %v717_v38 = vpop.f32.mrf.mxu1 }
 0x1bc   : > { %854 = vst [vmem:[%s1330_s23 + $0x18] sm:$0xff] %v838_v37  ;;  %v836_v39 = vadd.f32 %v1011_v31, %v717_v38 }
 0x1bd   : > { %v1106_v40 = vpop.f32.mrf.mxu1 }
 0x1be   : > { %852 = vst [vmem:[%s1330_s23 + $0x8] sm:$0xff] %v836_v39  ;;  %v841_v41 = vadd.f32 %v1106_v40, %v1011_v31 }
 0x1bf   : > { %v730_v42 = vpop.f32.mrf.mxu1 }
 0x1c0   : > { %857 = vst [vmem:[%s1330_s23 + $0x30] sm:$0xff] %v841_v41  ;;  %v839_v43 = vadd.f32 %v1011_v31, %v730_v42 }
 0x1c1   : > { %v1107_v44 = vpop.f32.mrf.mxu1 }
 0x1c2   : > { %855 = vst [vmem:[%s1330_s23 + $0x20] sm:$0xff] %v839_v43  ;;  %v842_v45 = vadd.f32 %v1107_v44, %v1011_v31 }
 0x1c3   : > { %v733_v46 = vpop.f32.mrf.mxu1 }
 0x1c4   : > { %858 = vst [vmem:[%s1330_s23 + $0x38] sm:$0xff] %v842_v45  ;;  %v840_v47 = vadd.f32 %v1011_v31, %v733_v46 }
 0x1c5   : > { %v1110_v48 = vpop.f32.mrf.mxu1 }
 0x1c6   : > { %856 = vst [vmem:[%s1330_s23 + $0x28] sm:$0xff] %v840_v47  ;;  %v845_v49 = vadd.f32 %v1110_v48, %v1011_v31 }
 0x1c7   : > { %v746_v50 = vpop.f32.mrf.mxu1 }
 0x1c8   : > { %861 = vst [vmem:[%s1330_s23 + $0x50] sm:$0xff] %v845_v49  ;;  %v843_v51 = vadd.f32 %v1011_v31, %v746_v50 }
 0x1c9   : > { %v1111_v52 = vpop.f32.mrf.mxu1 }
 0x1ca   : > { %859 = vst [vmem:[%s1330_s23 + $0x40] sm:$0xff] %v843_v51  ;;  %v846_v53 = vadd.f32 %v1111_v52, %v1011_v31 }
 0x1cb   : > { %v749_v54 = vpop.f32.mrf.mxu1 }
 0x1cc   : > { %862 = vst [vmem:[%s1330_s23 + $0x58] sm:$0xff] %v846_v53  ;;  %v844_v55 = vadd.f32 %v1011_v31, %v749_v54 }
 0x1cd   : > { %v1114_v56 = vpop.f32.mrf.mxu1 }
 0x1ce   : > { %860 = vst [vmem:[%s1330_s23 + $0x48] sm:$0xff] %v844_v55  ;;  %v849_v57 = vadd.f32 %v1114_v56, %v1011_v31 }
 0x1cf   : > { %v762_v58 = vpop.f32.mrf.mxu1 }
 0x1d0   : > { %865 = vst [vmem:[%s1330_s23 + $0x70] sm:$0xff] %v849_v57  ;;  %v847_v59 = vadd.f32 %v1011_v31, %v762_v58 }
 0x1d1   : > { %v1115_v60 = vpop.f32.mrf.mxu1 }
 0x1d2   : > { %863 = vst [vmem:[%s1330_s23 + $0x60] sm:$0xff] %v847_v59  ;;  %v850_v61 = vadd.f32 %v1115_v60, %v1011_v31 }
 0x1d3   : > { %v765_v62 = vpop.f32.mrf.mxu1 }
 0x1d4   : > { %866 = vst [vmem:[%s1330_s23 + $0x78] sm:$0xff] %v850_v61  ;;  %v848_v63 = vadd.f32 %v1011_v31, %v765_v62 }
 0x1d6   : > { %864 = vst [vmem:[%s1330_s23 + $0x68] sm:$0xff] %v848_v63 }
 0x1d7 PF: > { %s15_s20 = sadd.s32 1, %s1201_s20   ;;  %s1363_s18 = smov %s1197_s19 }
 0x1d8   : > { %p12_p5 = scmp.ge.s32.totalorder %s15_s20, 6   ;;  %s1364_s19 = smov %s1366_s21 }
 0x1da   :  { %14 = sbr.rel (!%p12_p5) target bundleno = 2 (0x2), region = 87 }

</bundles_post_ra>
